<compile_context>
chip_gen: v7x
topology: tpu7x:2x2x1
jax: 0.10.0
libtpu: 0.0.40
codegen_flags: <defaults>
</compile_context>

<pallas_src>
import jax
import jax.numpy as jnp
import numpy as np
from jax.experimental import pallas as pl
from jax.experimental.pallas import tpu as pltpu


def _decoder_kernel(emb_ref, h2_ref, hprev_ref, enc_ref,
                    wa_e_ref, wa_h_ref, attn_b_ref,
                    wc_e_ref, wc_a_ref, comb_b_ref,
                    wih_r_ref, wih_z_ref, wih_n_ref,
                    whh_r_ref, whh_z_ref, whh_n_ref,
                    b_r_ref, b_z_ref, b_in_ref, b_hn_ref,
                    out_w_ref, out_b_ref,
                    logits_ref, hnew_ref, attnw_ref,
                    h_sc):
    f32 = jnp.float32
    bf16 = jnp.bfloat16
    v = pl.program_id(0)

    # ---- attention + GRU step: computed once, carried across the vocab grid axis ----
    @pl.when(v == 0)
    def _():
        emb = emb_ref[...]                       # (B, H)  f32 (gathered in XLA)
        h2 = h2_ref[...]                         # (B, 2H) f32
        emb_b = emb.astype(bf16)
        h2_b = h2.astype(bf16)

        # attention logits: split weights -> two MXU dots + VPU add (no lane-axis concat)
        a_logits = (jnp.dot(emb_b, wa_e_ref[...], preferred_element_type=f32)
                    + jnp.dot(h2_b, wa_h_ref[...], preferred_element_type=f32)
                    + attn_b_ref[...])           # (B, L)
        m = jnp.max(a_logits, axis=-1, keepdims=True)
        e = jnp.exp(a_logits - m)
        attn_w = e * pl.reciprocal(jnp.sum(e, axis=-1, keepdims=True), approx=True)
        attnw_ref[...] = attn_w                  # (B, L)

        # bmm((B,1,L),(B,L,2H)) as broadcast-multiply + reduce over L (VPU/XLU, not MXU)
        attn_applied = jnp.sum(attn_w[:, :, None] * enc_ref[...], axis=1)   # (B, 2H)

        # attn_combine + relu (split weights, no concat)
        gru_in = (jnp.dot(emb_b, wc_e_ref[...], preferred_element_type=f32)
                  + jnp.dot(attn_applied.astype(bf16), wc_a_ref[...],
                            preferred_element_type=f32)
                  + comb_b_ref[...])             # (B, H)
        gru_in = jnp.maximum(gru_in, 0.0)
        gru_in_b = gru_in.astype(bf16)

        # single-step GRU (PyTorch gate ordering r, z, n), per-gate weights ->
        # lane-aligned, no [:, k*H:(k+1)*H] slicing of a (B, 3H) activation.
        h_prev = hprev_ref[...]                  # (B, H) = hidden[:, :, :H] (sliced in XLA)
        h_prev_b = h_prev.astype(bf16)
        r = jax.nn.sigmoid(
            jnp.dot(gru_in_b, wih_r_ref[...], preferred_element_type=f32)
            + jnp.dot(h_prev_b, whh_r_ref[...], preferred_element_type=f32)
            + b_r_ref[...])
        z = jax.nn.sigmoid(
            jnp.dot(gru_in_b, wih_z_ref[...], preferred_element_type=f32)
            + jnp.dot(h_prev_b, whh_z_ref[...], preferred_element_type=f32)
            + b_z_ref[...])
        gi_n = jnp.dot(gru_in_b, wih_n_ref[...], preferred_element_type=f32) + b_in_ref[...]
        gh_n = jnp.dot(h_prev_b, whh_n_ref[...], preferred_element_type=f32) + b_hn_ref[...]
        n = jnp.tanh(gi_n + r * gh_n)
        h_new = (1.0 - z) * n + z * h_prev       # (B, H)

        h_sc[...] = h_new                        # carried across vocab tiles
        hnew_ref[...] = h_new

    # ---- per-tile output projection: logits tile = h_new @ out_w[:, tile] + out_b[tile] ----
    logits_ref[...] = (jnp.dot(h_sc[...].astype(bf16), out_w_ref[...],
                               preferred_element_type=f32)
                       + out_b_ref[...])


def attn_decoder_forward(params, input_idx, hidden, encoder_outputs):
    f32 = jnp.float32
    B = input_idx.shape[0]
    H = params['wc_e'].shape[0]
    V = params['out_w'].shape[1]
    L = encoder_outputs.shape[1]

    # Embedding: gather only B rows of the table (instead of streaming V x H into VMEM).
    embedded = jnp.take(params['emb'], input_idx[:, 0].astype(jnp.int32), axis=0)  # (B, H)
    # TODO(synk): nn.Dropout implemented as identity (eval-mode / inference semantics).

    h2 = hidden.reshape(B, 2 * H).astype(f32)    # hidden.view(1, B, -1), batch-major
    h_prev = h2[:, :H]                           # hidden[:, :, :hidden_size]; sliced in XLA so the
                                                 # kernel never lane-slices a (B, 2H) activation.

    # Vocab tiling: full V for small vocab, otherwise 512-wide (multiple of 128) tiles
    # streamed with double-buffered DMA.
    TV = V if V <= 512 else 512
    NV = pl.cdiv(V, TV)

    def full_spec(shape):
        if len(shape) == 2:
            return pl.BlockSpec(shape, lambda v: (0, 0))
        return pl.BlockSpec(shape, lambda v: (0, 0, 0))

    in_specs = [
        full_spec((B, H)),            # embedded
        full_spec((B, 2 * H)),        # h2
        full_spec((B, H)),            # h_prev
        full_spec((B, L, 2 * H)),     # encoder_outputs
        full_spec((H, L)),            # wa_e
        full_spec((2 * H, L)),        # wa_h
        full_spec((1, L)),            # attn_b
        full_spec((H, H)),            # wc_e
        full_spec((2 * H, H)),        # wc_a
        full_spec((1, H)),            # comb_b
        full_spec((H, H)),            # wih_r
        full_spec((H, H)),            # wih_z
        full_spec((H, H)),            # wih_n
        full_spec((H, H)),            # whh_r
        full_spec((H, H)),            # whh_z
        full_spec((H, H)),            # whh_n
        full_spec((1, H)),            # b_r
        full_spec((1, H)),            # b_z
        full_spec((1, H)),            # b_in
        full_spec((1, H)),            # b_hn
        pl.BlockSpec((H, TV), lambda v: (0, v)),   # out_w streamed over the vocab axis
        pl.BlockSpec((1, TV), lambda v: (0, v)),   # out_b streamed over the vocab axis
    ]
    out_specs = (
        pl.BlockSpec((B, TV), lambda v: (0, v)),   # logits tile (lane-dense per tile)
        full_spec((B, H)),                         # h_new (resident across vocab axis)
        full_spec((B, L)),                         # attn weights (resident across vocab axis)
    )

    # Advisory cost estimate so XLA schedules surrounding ops sensibly.
    flops = 2 * B * (3 * H * L + 9 * H * H + H * V) + 2 * B * L * 2 * H
    bytes_w = 2 * (3 * H * L + 9 * H * H + H * V)                       # bf16 weights
    bytes_io = 4 * (B * (4 * H) + B * L * 2 * H + L + 5 * H + V
                    + B * V + B * H + B * L)                            # f32 acts / biases / outputs
    cost = pl.CostEstimate(flops=flops, transcendentals=B * (L + 3 * H),
                           bytes_accessed=bytes_w + bytes_io)

    logits, h_new, attn_w = pl.pallas_call(
        _decoder_kernel,
        out_shape=(jax.ShapeDtypeStruct((B, V), f32),
                   jax.ShapeDtypeStruct((B, H), f32),
                   jax.ShapeDtypeStruct((B, L), f32)),
        grid=(NV,),
        in_specs=in_specs,
        out_specs=out_specs,
        scratch_shapes=[pltpu.VMEM((B, H), f32)],
        compiler_params=pltpu.CompilerParams(
            # "arbitrary": the GRU/attention state (scratch + resident outputs) is carried
            # across the vocab axis. TODO(synk): for v7x 2-TC sharding, recompute the
            # pre-projection math per tile and mark this axis "parallel".
            dimension_semantics=("arbitrary",),
            vmem_limit_bytes=32 * 1024 * 1024),
        cost_estimate=cost,
    )(embedded, h2, h_prev, encoder_outputs,
      params['wa_e'], params['wa_h'], params['attn_b'],
      params['wc_e'], params['wc_a'], params['comb_b'],
      params['wih_r'], params['wih_z'], params['wih_n'],
      params['whh_r'], params['whh_z'], params['whh_n'],
      params['b_r'], params['b_z'], params['b_in'], params['b_hn'],
      params['out_w'], params['out_b'])

    # Finish log_softmax in XLA: a single (B, V) pass, negligible next to out_w streaming.
    log_probs = jax.nn.log_softmax(logits, axis=-1)
    output = log_probs.reshape(B, 1, V)                  # [B, 1, V]
    hidden_out = jnp.stack([h_new, h_new], axis=0)       # torch.cat((hidden, hidden), 0) -> [2, B, H]
    attn_weights = attn_w.reshape(B, 1, L)               # [B, 1, L]
    return output, hidden_out, attn_weights


def _reference_forward(params, input_idx, hidden, encoder_outputs):
    """Pure-JAX f32 reference of the same forward pass (eval-mode dropout, same bf16 weights)."""
    f32 = jnp.float32
    B = input_idx.shape[0]
    H = params['wc_e'].shape[0]
    V = params['out_w'].shape[1]
    L = encoder_outputs.shape[1]

    emb = params['emb'][input_idx[:, 0]]
    h2 = hidden.reshape(B, 2 * H)
    a_logits = (emb @ params['wa_e'].astype(f32) + h2 @ params['wa_h'].astype(f32)
                + params['attn_b'])
    aw = jax.nn.softmax(a_logits, axis=-1)
    applied = jnp.einsum('bl,blh->bh', aw, encoder_outputs)
    gru_in = jax.nn.relu(emb @ params['wc_e'].astype(f32)
                         + applied @ params['wc_a'].astype(f32) + params['comb_b'])
    h_prev = h2[:, :H]
    r = jax.nn.sigmoid(gru_in @ params['wih_r'].astype(f32)
                       + h_prev @ params['whh_r'].astype(f32) + params['b_r'])
    z = jax.nn.sigmoid(gru_in @ params['wih_z'].astype(f32)
                       + h_prev @ params['whh_z'].astype(f32) + params['b_z'])
    n = jnp.tanh(gru_in @ params['wih_n'].astype(f32) + params['b_in']
                 + r * (h_prev @ params['whh_n'].astype(f32) + params['b_hn']))
    h_new = (1.0 - z) * n + z * h_prev
    logp = jax.nn.log_softmax(h_new @ params['out_w'].astype(f32) + params['out_b'], axis=-1)
    return logp.reshape(B, 1, V), jnp.stack([h_new, h_new], axis=0), aw.reshape(B, 1, L)


def init_params(key, hidden_size, output_voc_size, max_length):
    H, V, L = hidden_size, output_voc_size, max_length
    ks = jax.random.split(key, 19)
    bf16 = jnp.bfloat16

    def u(k, shape, fan_in, dtype=jnp.float32):
        bound = 1.0 / np.sqrt(fan_in)
        return jax.random.uniform(k, shape, jnp.float32, -bound, bound).astype(dtype)

    return {
        # embedding stays f32: only B rows are ever gathered (outside the kernel)
        'emb':    jax.random.normal(ks[0], (V, H), jnp.float32),
        # attn = Linear(3H, L), stored transposed and split into (emb | hidden) blocks, bf16
        'wa_e':   u(ks[1], (H, L), 3 * H, bf16),
        'wa_h':   u(ks[2], (2 * H, L), 3 * H, bf16),
        'attn_b': u(ks[3], (1, L), 3 * H),
        # attn_combine = Linear(3H, H), split into (emb | attn_applied) blocks, bf16
        'wc_e':   u(ks[4], (H, H), 3 * H, bf16),
        'wc_a':   u(ks[5], (2 * H, H), 3 * H, bf16),
        'comb_b': u(ks[6], (1, H), 3 * H),
        # GRU weights stored per-gate (r, z, n), transposed, bf16
        'wih_r':  u(ks[7], (H, H), H, bf16),
        'wih_z':  u(ks[8], (H, H), H, bf16),
        'wih_n':  u(ks[9], (H, H), H, bf16),
        'whh_r':  u(ks[10], (H, H), H, bf16),
        'whh_z':  u(ks[11], (H, H), H, bf16),
        'whh_n':  u(ks[12], (H, H), H, bf16),
        # r/z biases pre-summed (b_ih + b_hh); n-gate biases kept separate (PyTorch GRU form)
        'b_r':    u(ks[13], (1, H), H),
        'b_z':    u(ks[14], (1, H), H),
        'b_in':   u(ks[15], (1, H), H),
        'b_hn':   u(ks[16], (1, H), H),
        # out = Linear(H, V), transposed, bf16 (streamed through VMEM in vocab tiles)
        'out_w':  u(ks[17], (H, V), H, bf16),
        'out_b':  u(ks[18], (1, V), H),
    }


if __name__ == "__main__":
    B, H, L, V = 2, 32, 10, 64   # batch, hidden_size, max_length, output_voc_size

    key = jax.random.PRNGKey(0)
    kp, ki, kh, ke = jax.random.split(key, 4)

    params = init_params(kp, H, V, L)
    input_idx = jax.random.randint(ki, (B, 1), 0, V, dtype=jnp.int32)
    hidden = jax.random.normal(kh, (1, B, 2 * H), jnp.float32)           # bidirectional hidden (viewed)
    encoder_outputs = jax.random.normal(ke, (B, L, 2 * H), jnp.float32)  # bidirectional enc outputs

    out, hid, aw = attn_decoder_forward(params, input_idx, hidden, encoder_outputs)
    jax.block_until_ready((out, hid, aw))

    # sanity check against pure-JAX f32 reference (kernel uses bf16 weight matmuls)
    r_out, r_hid, r_aw = _reference_forward(params, input_idx, hidden, encoder_outputs)
    np.testing.assert_allclose(np.asarray(out), np.asarray(r_out), atol=3e-2, rtol=3e-2)
    np.testing.assert_allclose(np.asarray(hid), np.asarray(r_hid), atol=3e-2, rtol=3e-2)
    np.testing.assert_allclose(np.asarray(aw), np.asarray(r_aw), atol=3e-2, rtol=3e-2)

    assert out.shape == (B, 1, V) and hid.shape == (2, B, H) and aw.shape == (B, 1, L)
    print("KERNEL_OK")
</pallas_src>

<mosaic_0001>
module attributes {stable_mosaic.version = 11 : i64} {
  func.func @_decoder_kernel(%arg0: i32, %arg1: memref<2x32xf32, #tpu.memory_space<vmem>>, %arg2: memref<2x64xf32, #tpu.memory_space<vmem>>, %arg3: memref<2x32xf32, #tpu.memory_space<vmem>>, %arg4: memref<2x10x64xf32, #tpu.memory_space<vmem>>, %arg5: memref<32x10xbf16, #tpu.memory_space<vmem>>, %arg6: memref<64x10xbf16, #tpu.memory_space<vmem>>, %arg7: memref<1x10xf32, #tpu.memory_space<vmem>>, %arg8: memref<32x32xbf16, #tpu.memory_space<vmem>>, %arg9: memref<64x32xbf16, #tpu.memory_space<vmem>>, %arg10: memref<1x32xf32, #tpu.memory_space<vmem>>, %arg11: memref<32x32xbf16, #tpu.memory_space<vmem>>, %arg12: memref<32x32xbf16, #tpu.memory_space<vmem>>, %arg13: memref<32x32xbf16, #tpu.memory_space<vmem>>, %arg14: memref<32x32xbf16, #tpu.memory_space<vmem>>, %arg15: memref<32x32xbf16, #tpu.memory_space<vmem>>, %arg16: memref<32x32xbf16, #tpu.memory_space<vmem>>, %arg17: memref<1x32xf32, #tpu.memory_space<vmem>>, %arg18: memref<1x32xf32, #tpu.memory_space<vmem>>, %arg19: memref<1x32xf32, #tpu.memory_space<vmem>>, %arg20: memref<1x32xf32, #tpu.memory_space<vmem>>, %arg21: memref<32x64xbf16, #tpu.memory_space<vmem>>, %arg22: memref<1x64xf32, #tpu.memory_space<vmem>>, %arg23: memref<2x64xf32, #tpu.memory_space<vmem>>, %arg24: memref<2x32xf32, #tpu.memory_space<vmem>>, %arg25: memref<2x10xf32, #tpu.memory_space<vmem>>, %arg26: memref<2x32xf32, #tpu.memory_space<vmem>>) attributes {dimension_semantics = [#tpu.dimension_semantics<arbitrary>], iteration_bounds = array<i64: 1>, scalar_prefetch = 0 : i64, scratch_operands = 1 : i64, tpu.core_type = #tpu.core_type<tc>, window_params = [{pipeline_mode = #tpu.pipeline_mode<synchronous>, transform_indices = @transform_0, window_bounds = array<i64: 2, 32>}, {pipeline_mode = #tpu.pipeline_mode<synchronous>, transform_indices = @transform_1, window_bounds = array<i64: 2, 64>}, {pipeline_mode = #tpu.pipeline_mode<synchronous>, transform_indices = @transform_2, window_bounds = array<i64: 2, 32>}, {pipeline_mode = #tpu.pipeline_mode<synchronous>, transform_indices = @transform_3, window_bounds = array<i64: 2, 10, 64>}, {pipeline_mode = #tpu.pipeline_mode<synchronous>, transform_indices = @transform_4, window_bounds = array<i64: 32, 10>}, {pipeline_mode = #tpu.pipeline_mode<synchronous>, transform_indices = @transform_5, window_bounds = array<i64: 64, 10>}, {pipeline_mode = #tpu.pipeline_mode<synchronous>, transform_indices = @transform_6, window_bounds = array<i64: 1, 10>}, {pipeline_mode = #tpu.pipeline_mode<synchronous>, transform_indices = @transform_7, window_bounds = array<i64: 32, 32>}, {pipeline_mode = #tpu.pipeline_mode<synchronous>, transform_indices = @transform_8, window_bounds = array<i64: 64, 32>}, {pipeline_mode = #tpu.pipeline_mode<synchronous>, transform_indices = @transform_9, window_bounds = array<i64: 1, 32>}, {pipeline_mode = #tpu.pipeline_mode<synchronous>, transform_indices = @transform_10, window_bounds = array<i64: 32, 32>}, {pipeline_mode = #tpu.pipeline_mode<synchronous>, transform_indices = @transform_11, window_bounds = array<i64: 32, 32>}, {pipeline_mode = #tpu.pipeline_mode<synchronous>, transform_indices = @transform_12, window_bounds = array<i64: 32, 32>}, {pipeline_mode = #tpu.pipeline_mode<synchronous>, transform_indices = @transform_13, window_bounds = array<i64: 32, 32>}, {pipeline_mode = #tpu.pipeline_mode<synchronous>, transform_indices = @transform_14, window_bounds = array<i64: 32, 32>}, {pipeline_mode = #tpu.pipeline_mode<synchronous>, transform_indices = @transform_15, window_bounds = array<i64: 32, 32>}, {pipeline_mode = #tpu.pipeline_mode<synchronous>, transform_indices = @transform_16, window_bounds = array<i64: 1, 32>}, {pipeline_mode = #tpu.pipeline_mode<synchronous>, transform_indices = @transform_17, window_bounds = array<i64: 1, 32>}, {pipeline_mode = #tpu.pipeline_mode<synchronous>, transform_indices = @transform_18, window_bounds = array<i64: 1, 32>}, {pipeline_mode = #tpu.pipeline_mode<synchronous>, transform_indices = @transform_19, window_bounds = array<i64: 1, 32>}, {transform_indices = @transform_20, window_bounds = array<i64: 32, 64>}, {transform_indices = @transform_21, window_bounds = array<i64: 1, 64>}, {transform_indices = @transform_22, window_bounds = array<i64: 2, 64>}, {pipeline_mode = #tpu.pipeline_mode<synchronous>, transform_indices = @transform_23, window_bounds = array<i64: 2, 32>}, {pipeline_mode = #tpu.pipeline_mode<synchronous>, transform_indices = @transform_24, window_bounds = array<i64: 2, 10>}]} {
    %c0_i32 = arith.constant 0 : i32
    %0 = arith.cmpi eq, %arg0, %c0_i32 : i32
    %1 = arith.extui %0 : i1 to i32
    %c0_i32_0 = arith.constant 0 : i32
    %2 = arith.cmpi ne, %1, %c0_i32_0 : i32
    scf.if %2 {
      %c0_8 = arith.constant 0 : index
      %c0_9 = arith.constant 0 : index
      %11 = vector.load %arg1[%c0_8, %c0_9] : memref<2x32xf32, #tpu.memory_space<vmem>>, vector<2x32xf32>
      %c0_10 = arith.constant 0 : index
      %c0_11 = arith.constant 0 : index
      %12 = vector.load %arg2[%c0_10, %c0_11] : memref<2x64xf32, #tpu.memory_space<vmem>>, vector<2x64xf32>
      %13 = arith.truncf %11 : vector<2x32xf32> to vector<2x32xbf16>
      %14 = arith.truncf %12 : vector<2x64xf32> to vector<2x64xbf16>
      %c0_12 = arith.constant 0 : index
      %c0_13 = arith.constant 0 : index
      %15 = vector.load %arg5[%c0_12, %c0_13] : memref<32x10xbf16, #tpu.memory_space<vmem>>, vector<32x10xbf16>
      %cst_14 = arith.constant dense<0.000000e+00> : vector<2x10xf32>
      %16 = tpu.matmul %13, %15, %cst_14 {dimension_numbers = #tpu.dot_dimension_numbers<[1], [0], [0], [1], [0, 0, 1, 1], [], []>} : vector<2x32xbf16>, vector<32x10xbf16>, vector<2x10xf32> -> vector<2x10xf32>
      %c0_15 = arith.constant 0 : index
      %c0_16 = arith.constant 0 : index
      %17 = vector.load %arg6[%c0_15, %c0_16] : memref<64x10xbf16, #tpu.memory_space<vmem>>, vector<64x10xbf16>
      %cst_17 = arith.constant dense<0.000000e+00> : vector<2x10xf32>
      %18 = tpu.matmul %14, %17, %cst_17 {dimension_numbers = #tpu.dot_dimension_numbers<[1], [0], [0], [1], [0, 0, 1, 1], [], []>} : vector<2x64xbf16>, vector<64x10xbf16>, vector<2x10xf32> -> vector<2x10xf32>
      %19 = arith.addf %16, %18 : vector<2x10xf32>
      %c0_18 = arith.constant 0 : index
      %c0_19 = arith.constant 0 : index
      %20 = vector.load %arg7[%c0_18, %c0_19] : memref<1x10xf32, #tpu.memory_space<vmem>>, vector<1x10xf32>
      %21 = vector.broadcast %20 : vector<1x10xf32> to vector<2x10xf32>
      %22 = arith.addf %19, %21 : vector<2x10xf32>
      %cst_20 = arith.constant dense<0xFF800000> : vector<2xf32>
      %23 = vector.multi_reduction <maximumf>, %22, %cst_20 [1] : vector<2x10xf32> to vector<2xf32>
      %24 = vector.shape_cast %23 : vector<2xf32> to vector<2x1xf32>
      %25 = vector.broadcast %24 : vector<2x1xf32> to vector<2x10xf32>
      %26 = arith.subf %22, %25 : vector<2x10xf32>
      %27 = math.exp %26 : vector<2x10xf32>
      %cst_21 = arith.constant dense<0.000000e+00> : vector<2xf32>
      %28 = vector.multi_reduction <add>, %27, %cst_21 [1] : vector<2x10xf32> to vector<2xf32>
      %29 = vector.shape_cast %28 : vector<2xf32> to vector<2x1xf32>
      %30 = tpu.reciprocal %29 {approx = true} : vector<2x1xf32> -> vector<2x1xf32>
      %31 = vector.broadcast %30 : vector<2x1xf32> to vector<2x10xf32>
      %32 = arith.mulf %27, %31 : vector<2x10xf32>
      %c0_22 = arith.constant 0 : index
      %c0_23 = arith.constant 0 : index
      %33 = vector.load %arg25[%c0_22, %c0_23] : memref<2x10xf32, #tpu.memory_space<vmem>>, vector<2x10xf32>
      tpu.vector_store %arg25[%c0_22, %c0_23], %32 {strides = array<i32>} : memref<2x10xf32, #tpu.memory_space<vmem>>, vector<2x10xf32>,
      %34 = vector.shape_cast %32 : vector<2x10xf32> to vector<2x10x1xf32>
      %c0_24 = arith.constant 0 : index
      %c0_25 = arith.constant 0 : index
      %c0_26 = arith.constant 0 : index
      %35 = vector.load %arg4[%c0_24, %c0_25, %c0_26] : memref<2x10x64xf32, #tpu.memory_space<vmem>>, vector<2x10x64xf32>
      %36 = vector.broadcast %34 : vector<2x10x1xf32> to vector<2x10x64xf32>
      %37 = arith.mulf %36, %35 : vector<2x10x64xf32>
      %cst_27 = arith.constant dense<0.000000e+00> : vector<2x64xf32>
      %38 = vector.multi_reduction <add>, %37, %cst_27 [1] : vector<2x10x64xf32> to vector<2x64xf32>
      %c0_28 = arith.constant 0 : index
      %c0_29 = arith.constant 0 : index
      %39 = vector.load %arg8[%c0_28, %c0_29] : memref<32x32xbf16, #tpu.memory_space<vmem>>, vector<32x32xbf16>
      %cst_30 = arith.constant dense<0.000000e+00> : vector<2x32xf32>
      %40 = tpu.matmul %13, %39, %cst_30 {dimension_numbers = #tpu.dot_dimension_numbers<[1], [0], [0], [1], [0, 0, 1, 1], [], []>} : vector<2x32xbf16>, vector<32x32xbf16>, vector<2x32xf32> -> vector<2x32xf32>
      %41 = arith.truncf %38 : vector<2x64xf32> to vector<2x64xbf16>
      %c0_31 = arith.constant 0 : index
      %c0_32 = arith.constant 0 : index
      %42 = vector.load %arg9[%c0_31, %c0_32] : memref<64x32xbf16, #tpu.memory_space<vmem>>, vector<64x32xbf16>
      %cst_33 = arith.constant dense<0.000000e+00> : vector<2x32xf32>
      %43 = tpu.matmul %41, %42, %cst_33 {dimension_numbers = #tpu.dot_dimension_numbers<[1], [0], [0], [1], [0, 0, 1, 1], [], []>} : vector<2x64xbf16>, vector<64x32xbf16>, vector<2x32xf32> -> vector<2x32xf32>
      %44 = arith.addf %40, %43 : vector<2x32xf32>
      %c0_34 = arith.constant 0 : index
      %c0_35 = arith.constant 0 : index
      %45 = vector.load %arg10[%c0_34, %c0_35] : memref<1x32xf32, #tpu.memory_space<vmem>>, vector<1x32xf32>
      %46 = vector.broadcast %45 : vector<1x32xf32> to vector<2x32xf32>
      %47 = arith.addf %44, %46 : vector<2x32xf32>
      %cst_36 = arith.constant 0.000000e+00 : f32
      %48 = vector.broadcast %cst_36 : f32 to vector<2x32xf32>
      %49 = arith.maximumf %47, %48 : vector<2x32xf32>
      %50 = arith.truncf %49 : vector<2x32xf32> to vector<2x32xbf16>
      %c0_37 = arith.constant 0 : index
      %c0_38 = arith.constant 0 : index
      %51 = vector.load %arg3[%c0_37, %c0_38] : memref<2x32xf32, #tpu.memory_space<vmem>>, vector<2x32xf32>
      %52 = arith.truncf %51 : vector<2x32xf32> to vector<2x32xbf16>
      %c0_39 = arith.constant 0 : index
      %c0_40 = arith.constant 0 : index
      %53 = vector.load %arg11[%c0_39, %c0_40] : memref<32x32xbf16, #tpu.memory_space<vmem>>, vector<32x32xbf16>
      %cst_41 = arith.constant dense<0.000000e+00> : vector<2x32xf32>
      %54 = tpu.matmul %50, %53, %cst_41 {dimension_numbers = #tpu.dot_dimension_numbers<[1], [0], [0], [1], [0, 0, 1, 1], [], []>} : vector<2x32xbf16>, vector<32x32xbf16>, vector<2x32xf32> -> vector<2x32xf32>
      %c0_42 = arith.constant 0 : index
      %c0_43 = arith.constant 0 : index
      %55 = vector.load %arg14[%c0_42, %c0_43] : memref<32x32xbf16, #tpu.memory_space<vmem>>, vector<32x32xbf16>
      %cst_44 = arith.constant dense<0.000000e+00> : vector<2x32xf32>
      %56 = tpu.matmul %52, %55, %cst_44 {dimension_numbers = #tpu.dot_dimension_numbers<[1], [0], [0], [1], [0, 0, 1, 1], [], []>} : vector<2x32xbf16>, vector<32x32xbf16>, vector<2x32xf32> -> vector<2x32xf32>
      %57 = arith.addf %54, %56 : vector<2x32xf32>
      %c0_45 = arith.constant 0 : index
      %c0_46 = arith.constant 0 : index
      %58 = vector.load %arg17[%c0_45, %c0_46] : memref<1x32xf32, #tpu.memory_space<vmem>>, vector<1x32xf32>
      %59 = vector.broadcast %58 : vector<1x32xf32> to vector<2x32xf32>
      %60 = arith.addf %57, %59 : vector<2x32xf32>
      %61 = arith.negf %60 : vector<2x32xf32>
      %62 = math.exp %61 : vector<2x32xf32>
      %cst_47 = arith.constant 1.000000e+00 : f32
      %63 = vector.broadcast %cst_47 : f32 to vector<2x32xf32>
      %64 = arith.addf %63, %62 : vector<2x32xf32>
      %65 = arith.divf %63, %64 : vector<2x32xf32>
      %c0_48 = arith.constant 0 : index
      %c0_49 = arith.constant 0 : index
      %66 = vector.load %arg12[%c0_48, %c0_49] : memref<32x32xbf16, #tpu.memory_space<vmem>>, vector<32x32xbf16>
      %cst_50 = arith.constant dense<0.000000e+00> : vector<2x32xf32>
      %67 = tpu.matmul %50, %66, %cst_50 {dimension_numbers = #tpu.dot_dimension_numbers<[1], [0], [0], [1], [0, 0, 1, 1], [], []>} : vector<2x32xbf16>, vector<32x32xbf16>, vector<2x32xf32> -> vector<2x32xf32>
      %c0_51 = arith.constant 0 : index
      %c0_52 = arith.constant 0 : index
      %68 = vector.load %arg15[%c0_51, %c0_52] : memref<32x32xbf16, #tpu.memory_space<vmem>>, vector<32x32xbf16>
      %cst_53 = arith.constant dense<0.000000e+00> : vector<2x32xf32>
      %69 = tpu.matmul %52, %68, %cst_53 {dimension_numbers = #tpu.dot_dimension_numbers<[1], [0], [0], [1], [0, 0, 1, 1], [], []>} : vector<2x32xbf16>, vector<32x32xbf16>, vector<2x32xf32> -> vector<2x32xf32>
      %70 = arith.addf %67, %69 : vector<2x32xf32>
      %c0_54 = arith.constant 0 : index
      %c0_55 = arith.constant 0 : index
      %71 = vector.load %arg18[%c0_54, %c0_55] : memref<1x32xf32, #tpu.memory_space<vmem>>, vector<1x32xf32>
      %72 = vector.broadcast %71 : vector<1x32xf32> to vector<2x32xf32>
      %73 = arith.addf %70, %72 : vector<2x32xf32>
      %74 = arith.negf %73 : vector<2x32xf32>
      %75 = math.exp %74 : vector<2x32xf32>
      %cst_56 = arith.constant 1.000000e+00 : f32
      %76 = vector.broadcast %cst_56 : f32 to vector<2x32xf32>
      %77 = arith.addf %76, %75 : vector<2x32xf32>
      %78 = arith.divf %76, %77 : vector<2x32xf32>
      %c0_57 = arith.constant 0 : index
      %c0_58 = arith.constant 0 : index
      %79 = vector.load %arg13[%c0_57, %c0_58] : memref<32x32xbf16, #tpu.memory_space<vmem>>, vector<32x32xbf16>
      %cst_59 = arith.constant dense<0.000000e+00> : vector<2x32xf32>
      %80 = tpu.matmul %50, %79, %cst_59 {dimension_numbers = #tpu.dot_dimension_numbers<[1], [0], [0], [1], [0, 0, 1, 1], [], []>} : vector<2x32xbf16>, vector<32x32xbf16>, vector<2x32xf32> -> vector<2x32xf32>
      %c0_60 = arith.constant 0 : index
      %c0_61 = arith.constant 0 : index
      %81 = vector.load %arg19[%c0_60, %c0_61] : memref<1x32xf32, #tpu.memory_space<vmem>>, vector<1x32xf32>
      %82 = vector.broadcast %81 : vector<1x32xf32> to vector<2x32xf32>
      %83 = arith.addf %80, %82 : vector<2x32xf32>
      %c0_62 = arith.constant 0 : index
      %c0_63 = arith.constant 0 : index
      %84 = vector.load %arg16[%c0_62, %c0_63] : memref<32x32xbf16, #tpu.memory_space<vmem>>, vector<32x32xbf16>
      %cst_64 = arith.constant dense<0.000000e+00> : vector<2x32xf32>
      %85 = tpu.matmul %52, %84, %cst_64 {dimension_numbers = #tpu.dot_dimension_numbers<[1], [0], [0], [1], [0, 0, 1, 1], [], []>} : vector<2x32xbf16>, vector<32x32xbf16>, vector<2x32xf32> -> vector<2x32xf32>
      %c0_65 = arith.constant 0 : index
      %c0_66 = arith.constant 0 : index
      %86 = vector.load %arg20[%c0_65, %c0_66] : memref<1x32xf32, #tpu.memory_space<vmem>>, vector<1x32xf32>
      %87 = vector.broadcast %86 : vector<1x32xf32> to vector<2x32xf32>
      %88 = arith.addf %85, %87 : vector<2x32xf32>
      %89 = arith.mulf %65, %88 : vector<2x32xf32>
      %90 = arith.addf %83, %89 : vector<2x32xf32>
      %91 = math.tanh %90 : vector<2x32xf32>
      %cst_67 = arith.constant 1.000000e+00 : f32
      %92 = vector.broadcast %cst_67 : f32 to vector<2x32xf32>
      %93 = arith.subf %92, %78 : vector<2x32xf32>
      %94 = arith.mulf %93, %91 : vector<2x32xf32>
      %95 = arith.mulf %78, %51 : vector<2x32xf32>
      %96 = arith.addf %94, %95 : vector<2x32xf32>
      %c0_68 = arith.constant 0 : index
      %c0_69 = arith.constant 0 : index
      %97 = vector.load %arg26[%c0_68, %c0_69] : memref<2x32xf32, #tpu.memory_space<vmem>>, vector<2x32xf32>
      tpu.vector_store %arg26[%c0_68, %c0_69], %96 {strides = array<i32>} : memref<2x32xf32, #tpu.memory_space<vmem>>, vector<2x32xf32>,
      %c0_70 = arith.constant 0 : index
      %c0_71 = arith.constant 0 : index
      %98 = vector.load %arg24[%c0_70, %c0_71] : memref<2x32xf32, #tpu.memory_space<vmem>>, vector<2x32xf32>
      tpu.vector_store %arg24[%c0_70, %c0_71], %96 {strides = array<i32>} : memref<2x32xf32, #tpu.memory_space<vmem>>, vector<2x32xf32>,
    } else {
    }
    %c0 = arith.constant 0 : index
    %c0_1 = arith.constant 0 : index
    %3 = vector.load %arg26[%c0, %c0_1] : memref<2x32xf32, #tpu.memory_space<vmem>>, vector<2x32xf32>
    %4 = arith.truncf %3 : vector<2x32xf32> to vector<2x32xbf16>
    %c0_2 = arith.constant 0 : index
    %c0_3 = arith.constant 0 : index
    %5 = vector.load %arg21[%c0_2, %c0_3] : memref<32x64xbf16, #tpu.memory_space<vmem>>, vector<32x64xbf16>
    %cst = arith.constant dense<0.000000e+00> : vector<2x64xf32>
    %6 = tpu.matmul %4, %5, %cst {dimension_numbers = #tpu.dot_dimension_numbers<[1], [0], [0], [1], [0, 0, 1, 1], [], []>} : vector<2x32xbf16>, vector<32x64xbf16>, vector<2x64xf32> -> vector<2x64xf32>
    %c0_4 = arith.constant 0 : index
    %c0_5 = arith.constant 0 : index
    %7 = vector.load %arg22[%c0_4, %c0_5] : memref<1x64xf32, #tpu.memory_space<vmem>>, vector<1x64xf32>
    %8 = vector.broadcast %7 : vector<1x64xf32> to vector<2x64xf32>
    %9 = arith.addf %6, %8 : vector<2x64xf32>
    %c0_6 = arith.constant 0 : index
    %c0_7 = arith.constant 0 : index
    %10 = vector.load %arg23[%c0_6, %c0_7] : memref<2x64xf32, #tpu.memory_space<vmem>>, vector<2x64xf32>
    tpu.vector_store %arg23[%c0_6, %c0_7], %9 {strides = array<i32>} : memref<2x64xf32, #tpu.memory_space<vmem>>, vector<2x64xf32>,
    return
  }
  func.func @transform_0(%arg0: i32) -> (i32, i32) {
    %c0_i32 = arith.constant 0 : i32
    %c0_i32_0 = arith.constant 0 : i32
    %c0_i32_1 = arith.constant 0 : i32
    return %c0_i32, %c0_i32_0 : i32, i32
  }
  func.func @transform_1(%arg0: i32) -> (i32, i32) {
    %c0_i32 = arith.constant 0 : i32
    %c0_i32_0 = arith.constant 0 : i32
    %c0_i32_1 = arith.constant 0 : i32
    return %c0_i32, %c0_i32_0 : i32, i32
  }
  func.func @transform_2(%arg0: i32) -> (i32, i32) {
    %c0_i32 = arith.constant 0 : i32
    %c0_i32_0 = arith.constant 0 : i32
    %c0_i32_1 = arith.constant 0 : i32
    return %c0_i32, %c0_i32_0 : i32, i32
  }
  func.func @transform_3(%arg0: i32) -> (i32, i32, i32) {
    %c0_i32 = arith.constant 0 : i32
    %c0_i32_0 = arith.constant 0 : i32
    %c0_i32_1 = arith.constant 0 : i32
    %c0_i32_2 = arith.constant 0 : i32
    return %c0_i32, %c0_i32_0, %c0_i32_1 : i32, i32, i32
  }
  func.func @transform_4(%arg0: i32) -> (i32, i32) {
    %c0_i32 = arith.constant 0 : i32
    %c0_i32_0 = arith.constant 0 : i32
    %c0_i32_1 = arith.constant 0 : i32
    return %c0_i32, %c0_i32_0 : i32, i32
  }
  func.func @transform_5(%arg0: i32) -> (i32, i32) {
    %c0_i32 = arith.constant 0 : i32
    %c0_i32_0 = arith.constant 0 : i32
    %c0_i32_1 = arith.constant 0 : i32
    return %c0_i32, %c0_i32_0 : i32, i32
  }
  func.func @transform_6(%arg0: i32) -> (i32, i32) {
    %c0_i32 = arith.constant 0 : i32
    %c0_i32_0 = arith.constant 0 : i32
    %c0_i32_1 = arith.constant 0 : i32
    return %c0_i32, %c0_i32_0 : i32, i32
  }
  func.func @transform_7(%arg0: i32) -> (i32, i32) {
    %c0_i32 = arith.constant 0 : i32
    %c0_i32_0 = arith.constant 0 : i32
    %c0_i32_1 = arith.constant 0 : i32
    return %c0_i32, %c0_i32_0 : i32, i32
  }
  func.func @transform_8(%arg0: i32) -> (i32, i32) {
    %c0_i32 = arith.constant 0 : i32
    %c0_i32_0 = arith.constant 0 : i32
    %c0_i32_1 = arith.constant 0 : i32
    return %c0_i32, %c0_i32_0 : i32, i32
  }
  func.func @transform_9(%arg0: i32) -> (i32, i32) {
    %c0_i32 = arith.constant 0 : i32
    %c0_i32_0 = arith.constant 0 : i32
    %c0_i32_1 = arith.constant 0 : i32
    return %c0_i32, %c0_i32_0 : i32, i32
  }
  func.func @transform_10(%arg0: i32) -> (i32, i32) {
    %c0_i32 = arith.constant 0 : i32
    %c0_i32_0 = arith.constant 0 : i32
    %c0_i32_1 = arith.constant 0 : i32
    return %c0_i32, %c0_i32_0 : i32, i32
  }
  func.func @transform_11(%arg0: i32) -> (i32, i32) {
    %c0_i32 = arith.constant 0 : i32
    %c0_i32_0 = arith.constant 0 : i32
    %c0_i32_1 = arith.constant 0 : i32
    return %c0_i32, %c0_i32_0 : i32, i32
  }
  func.func @transform_12(%arg0: i32) -> (i32, i32) {
    %c0_i32 = arith.constant 0 : i32
    %c0_i32_0 = arith.constant 0 : i32
    %c0_i32_1 = arith.constant 0 : i32
    return %c0_i32, %c0_i32_0 : i32, i32
  }
  func.func @transform_13(%arg0: i32) -> (i32, i32) {
    %c0_i32 = arith.constant 0 : i32
    %c0_i32_0 = arith.constant 0 : i32
    %c0_i32_1 = arith.constant 0 : i32
    return %c0_i32, %c0_i32_0 : i32, i32
  }
  func.func @transform_14(%arg0: i32) -> (i32, i32) {
    %c0_i32 = arith.constant 0 : i32
    %c0_i32_0 = arith.constant 0 : i32
    %c0_i32_1 = arith.constant 0 : i32
    return %c0_i32, %c0_i32_0 : i32, i32
  }
  func.func @transform_15(%arg0: i32) -> (i32, i32) {
    %c0_i32 = arith.constant 0 : i32
    %c0_i32_0 = arith.constant 0 : i32
    %c0_i32_1 = arith.constant 0 : i32
    return %c0_i32, %c0_i32_0 : i32, i32
  }
  func.func @transform_16(%arg0: i32) -> (i32, i32) {
    %c0_i32 = arith.constant 0 : i32
    %c0_i32_0 = arith.constant 0 : i32
    %c0_i32_1 = arith.constant 0 : i32
    return %c0_i32, %c0_i32_0 : i32, i32
  }
  func.func @transform_17(%arg0: i32) -> (i32, i32) {
    %c0_i32 = arith.constant 0 : i32
    %c0_i32_0 = arith.constant 0 : i32
    %c0_i32_1 = arith.constant 0 : i32
    return %c0_i32, %c0_i32_0 : i32, i32
  }
  func.func @transform_18(%arg0: i32) -> (i32, i32) {
    %c0_i32 = arith.constant 0 : i32
    %c0_i32_0 = arith.constant 0 : i32
    %c0_i32_1 = arith.constant 0 : i32
    return %c0_i32, %c0_i32_0 : i32, i32
  }
  func.func @transform_19(%arg0: i32) -> (i32, i32) {
    %c0_i32 = arith.constant 0 : i32
    %c0_i32_0 = arith.constant 0 : i32
    %c0_i32_1 = arith.constant 0 : i32
    return %c0_i32, %c0_i32_0 : i32, i32
  }
  func.func @transform_20(%arg0: i32) -> (i32, i32) {
    %c0_i32 = arith.constant 0 : i32
    %c0_i32_0 = arith.constant 0 : i32
    return %c0_i32, %arg0 : i32, i32
  }
  func.func @transform_21(%arg0: i32) -> (i32, i32) {
    %c0_i32 = arith.constant 0 : i32
    %c0_i32_0 = arith.constant 0 : i32
    return %c0_i32, %arg0 : i32, i32
  }
  func.func @transform_22(%arg0: i32) -> (i32, i32) {
    %c0_i32 = arith.constant 0 : i32
    %c0_i32_0 = arith.constant 0 : i32
    return %c0_i32, %arg0 : i32, i32
  }
  func.func @transform_23(%arg0: i32) -> (i32, i32) {
    %c0_i32 = arith.constant 0 : i32
    %c0_i32_0 = arith.constant 0 : i32
    %c0_i32_1 = arith.constant 0 : i32
    return %c0_i32, %c0_i32_0 : i32, i32
  }
  func.func @transform_24(%arg0: i32) -> (i32, i32) {
    %c0_i32 = arith.constant 0 : i32
    %c0_i32_0 = arith.constant 0 : i32
    %c0_i32_1 = arith.constant 0 : i32
    return %c0_i32, %c0_i32_0 : i32, i32
  }
}

</mosaic_0001>

<bundles_post_ra>
// kernel: tpu_custom_call.1
= control target key start
LH: loop header
LB: loop body
LE: loop exit
PB: predicated region body
PF: predicated region fallthrough
CT: control target
= control target key end

     0   :  { %s1706_s0 = inlined_call_operand.vmem [shape: f32[2,32], index: 0, kind: input, shape index: {}]   ;;  %s1707_s1 = inlined_call_operand.hbm [shape: f32[2,64], index: 1, kind: input, shape index: {}]   ;;  %s1708_s2 = inlined_call_operand.hbm [shape: f32[2,32], index: 2, kind: input, shape index: {}]   ;;  %s1709_s3 = inlined_call_operand.vmem [shape: f32[2,10,64], index: 3, kind: input, shape index: {}]   ;;  %s1710_s4 = inlined_call_operand.vmem [shape: bf16[32,10], index: 4, kind: input, shape index: {}]   ;;  %s1711_s5 = inlined_call_operand.vmem [shape: bf16[64,10], index: 5, kind: input, shape index: {}]   ;;  %s1712_s6 = inlined_call_operand.vmem [shape: f32[1,10], index: 6, kind: input, shape index: {}]   ;;  %s1713_s7 = inlined_call_operand.vmem [shape: bf16[32,32], index: 7, kind: input, shape index: {}]   ;;  %s1714_s8 = inlined_call_operand.vmem [shape: bf16[64,32], index: 8, kind: input, shape index: {}]   ;;  %s1715_s9 = inlined_call_operand.vmem [shape: f32[1,32], index: 9, kind: input, shape index: {}]   ;;  %s1716_s10 = inlined_call_operand.vmem [shape: bf16[32,32], index: 10, kind: input, shape index: {}]   ;;  %s1717_s11 = inlined_call_operand.vmem [shape: bf16[32,32], index: 11, kind: input, shape index: {}]   ;;  %s1718_s12 = inlined_call_operand.vmem [shape: bf16[32,32], index: 12, kind: input, shape index: {}]   ;;  %s1719_s13 = inlined_call_operand.vmem [shape: bf16[32,32], index: 13, kind: input, shape index: {}]   ;;  %s1720_s14 = inlined_call_operand.vmem [shape: bf16[32,32], index: 14, kind: input, shape index: {}]   ;;  %s1721_s15 = inlined_call_operand.vmem [shape: bf16[32,32], index: 15, kind: input, shape index: {}]   ;;  %s1722_s16 = inlined_call_operand.vmem [shape: f32[1,32], index: 16, kind: input, shape index: {}]   ;;  %s1723_s17 = inlined_call_operand.vmem [shape: f32[1,32], index: 17, kind: input, shape index: {}]   ;;  %s1724_s18 = inlined_call_operand.vmem [shape: f32[1,32], index: 18, kind: input, shape index: {}]   ;;  %s1725_s19 = inlined_call_operand.vmem [shape: f32[1,32], index: 19, kind: input, shape index: {}]   ;;  %s1726_s20 = inlined_call_operand.vmem [shape: bf16[32,64], index: 20, kind: input, shape index: {}]   ;;  %s1727_s21 = inlined_call_operand.vmem [shape: f32[1,64], index: 21, kind: input, shape index: {}]   ;;  %s1728_s22 = inlined_call_operand.hbm [shape: f32[2,64], index: 22, kind: output, shape index: {0}]   ;;  %s1729_s23 = inlined_call_operand.hbm [shape: f32[2,32], index: 23, kind: output, shape index: {1}]   ;;  %s1730_s24 = inlined_call_operand.hbm [shape: f32[2,10], index: 24, kind: output, shape index: {2}]  }
   0x1   :  { %1738 = sst [smem:[#allocation16_spill]] %s1706_s0 }
   0x2   :  { %1739 = sst [smem:[#allocation17_spill]] %s1707_s1 }
   0x3   :  { %1740 = sst [smem:[#allocation18_spill]] %s1708_s2 }
   0x4   :  { %1741 = sst [smem:[#allocation19_spill]] %s1709_s3 }
   0x5   :  { %1742 = sst [smem:[#allocation20_spill]] %s1710_s4 }
   0x6   :  { %1743 = sst [smem:[#allocation21_spill]] %s1711_s5 }
   0x7   :  { %1744 = sst [smem:[#allocation22_spill]] %s1712_s6 }
   0x8   :  { %1745 = sst [smem:[#allocation23_spill]] %s1713_s7 }
   0x9   :  { %1746 = sst [smem:[#allocation24_spill]] %s1714_s8 }
   0xa   :  { %30 = vsyncpa [#allocation4], 0 }
   0xb   :  { %31 = vsyncpa [#allocation7], 0 }
   0xc   :  { %32 = vsyncpa [#allocation5], 0 }
   0xd   :  { %33 = vsyncpa [#allocation10], 0  ;;  %s1319_s5 = smov [#allocation3]   ;;  %s1320_s27 = smov [#allocation6]  }
   0xe   :  { %s42_s26 = sshll.u32 %s1319_s5, 4  ;;  %s52_s28 = sshll.u32 %s1320_s27, 4  ;;  %s43_s26 = int_to_ptr.vmem [resolvable:$true] %s42_s26  ;;  %s53_s28 = int_to_ptr.vmem [resolvable:$true] %s52_s28 }
   0xf   :  { %s1747_s29 = sld [smem:[#allocation17_spill]] }
  0x15   :  { %s1201_s0 = scalar_lea.hbm %s1747_s29, 32 }
  0x16   :  { %p1202_p0 = scmp.ne.s32.totalorder %s1747_s29, %s1201_s0  ;;  %p1205_p1 = scmp.lt.u32.totalorder %s1201_s0, %s1747_s29 }
  0x18   :  { %p1207_p2 = pnand %p1205_p1, %p1202_p0 }
  0x1a   :  { %1210 = shalt.err (!%p1207_p2)
}
  0x1b   :  { %s1211_s8 = scalar_lea.vmem %s43_s26, 32  ;;  %p1216_p4 = scmp.lt.s32.totalorder %s43_s26, %s43_s26 }
  0x1c   :  { %p1212_p3 = scmp.ne.s32.totalorder %s43_s26, %s1211_s8  ;;  %p1217_p5 = scmp.lt.s32.totalorder %s1211_s8, %s1211_s8 }
  0x1e   :  { %p1218_p6 = por %p1217_p5, %p1216_p4 }
  0x20   :  { %p1219_p7 = pnand %p1218_p6, %p1212_p3 }
  0x22   :  { %1222 = shalt.err (!%p1219_p7)
}
  0x23   :  { %45 = dma.hbm_to_vmem [thread:$0]  %s1747_s29, 32, %s43_s26, [#allocation4]  }
  0x24   :  { %s1748_s6 = sld [smem:[#allocation18_spill]] }
  0x2a   :  { %s1223_s2 = scalar_lea.hbm %s1748_s6, 32 }
  0x2b   :  { %p1224_p8 = scmp.ne.s32.totalorder %s1748_s6, %s1223_s2  ;;  %p1227_p9 = scmp.lt.u32.totalorder %s1223_s2, %s1748_s6 }
  0x2d   :  { %p1229_p10 = pnand %p1227_p9, %p1224_p8 }
  0x2f   :  { %1232 = shalt.err (!%p1229_p10)
}
  0x30   :  { %s1233_s25 = scalar_lea.vmem %s53_s28, 32  ;;  %p1238_p12 = scmp.lt.s32.totalorder %s53_s28, %s53_s28 }
  0x31   :  { %p1234_p11 = scmp.ne.s32.totalorder %s53_s28, %s1233_s25  ;;  %p1239_p13 = scmp.lt.s32.totalorder %s1233_s25, %s1233_s25 }
  0x33   :  { %p1240_p0 = por %p1239_p13, %p1238_p12 }
  0x35   :  { %p1241_p1 = pnand %p1240_p0, %p1234_p11 }
  0x37   :  { %1244 = shalt.err (!%p1241_p1)
}
  0x38   :  { %55 = dma.hbm_to_vmem [thread:$0]  %s1748_s6, 32, %s53_s28, [#allocation7]  }
  0x39   :  { %1311 = dma.done.wait [#allocation4], 32  }
  0x3a   :  { %1312 = vsyncadd [#allocation4], 4294967264 }
  0x3b   :  { %1313 = dma.done.wait [#allocation7], 32  }
  0x3c   :  { %1314 = vsyncadd [#allocation7], 4294967264  ;;  %v1321_v0 = vmov 0.0   ;;  %vm1322_vm0 = vmmov 0   ;;  %s1749_s1 = sld [smem:[#allocation21_spill]]  ;;  %s1750_s2 = sld [smem:[#allocation20_spill]]  ;;  %v266_v29 = vlaneseq }
  0x3d   :  { %1058 = vmatprep.subr.bf16.mxu0 %v1321_v0  ;;  %1070 = vmatprep.subr.bf16.mxu1 %v1321_v0  ;;  %vm201_vm1 = vcmask 261120   ;;  %s1751_s29 = sld [smem:[#allocation16_spill]]  ;;  %vm145_vm2 = vcmask 523264   ;;  %v106_v9 = vld [vmem:[#allocation3] sm:$0x3]  ;;  %s1752_s5 = sld [smem:[#allocation22_spill]] }
  0x3e   :  { %1074 = vmatprep.mubr.msk.bf16.mxu1 %vm1322_vm0, %v1321_v0  ;;  %1066 = vmatprep.mubr.msk.bf16.mxu0 %vm1322_vm0, %v1321_v0  ;;  %v108_v10 = vpack.c.bf16 %v106_v9, %v106_v9  ;;  %vm253_vm3 = vcmask 74752   ;;  %v267_v30 = vshrl.u32 %v266_v29, 7  ;;  %s1754_s25 = sld [smem:[#allocation23_spill]]  ;;  %v1173_v43 = vld [vmem:[%s1719_s13] sm:$0xff]   ;;  %v1174_v44 = vld [vmem:[%s1719_s13 + $0x8] sm:$0xff]   ;;  %s1755_s26 = sld [smem:[#allocation19_spill]] }
  0x3f   :  { %v1557_v45 = vld [vmem:[#allocation6] sm:$0x3]  ;;  %v1176_v48 = vld [vmem:[%s1720_s14 + $0x8] sm:$0xff]   ;;  %vm297_vm4 = vcmask 517120   ;;  %vm333_vm5 = vcmask 1041409   ;;  %vm858_vm6 = vcmask 254976  }
  0x40   :  { %v279_v31 = vsub.s32 1, %v267_v30  ;;  %v268_v32 = vsub.s32 0, %v267_v30  ;;  %v1562_v46 = vpack.c.bf16 %v1557_v45, %v1557_v45  ;;  %v1175_v47 = vld [vmem:[%s1720_s14] sm:$0xff]   ;;  %v1180_v29 = vld [vmem:[%s1718_s12 + $0x8] sm:$0xff]  }
  0x42   :  { %v1161_v1 = vld [vmem:[%s1749_s1] sm:$0xff]   ;;  %v1162_v2 = vld [vmem:[%s1749_s1 + $0x8] sm:$0xff]   ;;  %v1164_v5 = vld [vmem:[%s1749_s1 + $0x10] sm:$0xff]  }
  0x43   :  { %1059 = vmatpush3.bf16.msra.mxu0 %v1161_v1  ;;  %v1163_v3 = vld [vmem:[%s1750_s2] sm:$0xff]   ;;  %v1165_v4 = vld [vmem:[%s1750_s2 + $0x8] sm:$0xff]   ;;  %v1166_v8 = vld [vmem:[%s1749_s1 + $0x18] sm:$0xff]   ;;  %s1753_s2 = sld [smem:[#allocation24_spill]] }
  0x44   :  { %1060 = vmatprep.subr.bf16.mxu0 %v1321_v0  ;;  %1071 = vmatpush3.bf16.msra.mxu1 %v1163_v3  ;;  %v105_v6 = vld [vmem:[%s1751_s29] sm:$0x3]  ;;  %v1171_v41 = vld [vmem:[%s1754_s25 + $0x8] sm:$0xff]   ;;  %v290_v53 = vld [vmem:[%s1755_s26 + $0x10] sm:$0xff] }
  0x45   :  { %1072 = vmatprep.subr.bf16.mxu1 %v1321_v0  ;;  %v1502_v7 = vpack.c.bf16 %v105_v6, %v105_v6  ;;  %v983_v16 = vld [vmem:[%s1752_s5] ss:$0 sm:$0xff]  ;;  %v289_v51 = vld [vmem:[%s1755_s26 + $0x8] sm:$0x3]  ;;  %v291_v57 = vld [vmem:[%s1755_s26 + $0x18] sm:$0x3] }
  0x46   :  { %v1169_v39 = vld [vmem:[%s1754_s25] sm:$0xff]  }
  0x47   :  { %1061 = vmatpush3.bf16.msra.mxu0 %v1162_v2  ;;  %v288_v49 = vld [vmem:[%s1755_s26] sm:$0xff] }
  0x48   :  { %1062 = vmatprep.subr.bf16.mxu0 %v1321_v0  ;;  %1073 = vmatpush3.bf16.msra.mxu1 %v1165_v4 }
  0x49   :  { %1078 = vmatprep.subr.bf16.mxu1 %v1321_v0  ;;  %v1167_v37 = vld [vmem:[%s1753_s2] sm:$0xff]   ;;  %v1168_v38 = vld [vmem:[%s1753_s2 + $0x8] sm:$0xff]   ;;  %v1170_v40 = vld [vmem:[%s1753_s2 + $0x10] sm:$0xff]  }
  0x4a   :  { %v1172_v42 = vld [vmem:[%s1753_s2 + $0x18] sm:$0xff]  }
  0x4b   :  { %1063 = vmatpush3.bf16.msra.mxu0 %v1164_v5  ;;  %1075 = vmatmul.mubr.msk.bf16.vlgmr.msra.gmra.mrb[0].mxu1 %vm201_vm1, %v1502_v7 }
  0x4c   :  { %1064 = vmatprep.subr.bf16.mxu0 %v1321_v0  ;;  %1086 = vmatprep.mubr.msk.bf16.mxu1 %vm1322_vm0, %v1321_v0 }
  0x4d   :  { %1079 = vmatpush3.bf16.msra.mxu1 %v1167_v37 }
  0x4e   :  { %1080 = vmatprep.subr.bf16.mxu1 %v1321_v0 }
  0x4f   :  { %1065 = vmatpush3.bf16.msra.mxu0 %v1166_v8 }
  0x50   :  { %1090 = vmatprep.subr.bf16.mxu0 %v1321_v0 }
  0x51   :  { %1081 = vmatpush3.bf16.msra.mxu1 %v1168_v38 }
  0x52   :  { %1067 = vmatmul.mubr.msk.bf16.vlgmr.msra.gmra.mrb[0].mxu0 %vm145_vm2, %v108_v10  ;;  %1082 = vmatprep.subr.bf16.mxu1 %v1321_v0 }
  0x53   :  { %1094 = vmatprep.mubr.msk.bf16.mxu0 %vm1322_vm0, %v1321_v0  ;;  %1091 = vmatpush3.bf16.msra.mxu0 %v1169_v39  ;;  %v992_v39 = vld [vmem:[%s1715_s9] ss:$0 sm:$0xff] }
  0x54   :  { %1092 = vmatprep.subr.bf16.mxu0 %v1321_v0 }
  0x55   :  { %1083 = vmatpush3.bf16.msra.mxu1 %v1170_v40 }
  0x56   :  { %1084 = vmatprep.subr.bf16.mxu1 %v1321_v0 }
  0x57   :  { %1093 = vmatpush3.bf16.msra.mxu0 %v1171_v41 }
  0x58   :  { %1098 = vmatprep.subr.bf16.mxu0 %v1321_v0 }
  0x59   :  { %1085 = vmatpush3.bf16.msra.mxu1 %v1172_v42 }
  0x5a   :  { %1095 = vmatmul.mubr.msk.bf16.vlgmr.msra.gmra.mrb[4].mxu0 %vm201_vm1, %v1502_v7  ;;  %1106 = vmatprep.subr.bf16.mxu1 %v1321_v0 }
  0x5b   :  { %1102 = vmatprep.mubr.msk.bf16.mxu0 %vm1322_vm0, %v1321_v0  ;;  %1099 = vmatpush3.bf16.msra.mxu0 %v1173_v43 }
  0x5c   :  { %1100 = vmatprep.subr.bf16.mxu0 %v1321_v0 }
  0x5f   :  { %1101 = vmatpush3.bf16.msra.mxu0 %v1174_v44 }
  0x60   :  { %1114 = vmatprep.subr.bf16.mxu0 %v1321_v0 }
  0x62   :  { %1103 = vmatmul.mubr.msk.bf16.vlgmr.msra.gmra.mrb[8].mxu0 %vm201_vm1, %v1562_v46 }
  0x63   :  { %1115 = vmatpush3.bf16.msra.mxu0 %v1175_v47  ;;  %1118 = vmatprep.mubr.msk.bf16.mxu0 %vm1322_vm0, %v1321_v0 }
  0x64   :  { %1116 = vmatprep.subr.bf16.mxu0 %v1321_v0 }
  0x67   :  { %1117 = vmatpush3.bf16.msra.mxu0 %v1176_v48  ;;  %v1181_v48 = vld [vmem:[%s1717_s11] sm:$0xff]  }
  0x68   :  { %1130 = vmatprep.subr.bf16.mxu0 %v1321_v0 }
  0x6a   :  { %1119 = vmatmul.mubr.msk.bf16.vlgmr.msra.gmra.mrb[12].mxu0 %vm201_vm1, %v1562_v46 }
  0x6b   :  { %1134 = vmatprep.mubr.msk.bf16.mxu0 %vm1322_vm0, %v1321_v0 }
 0x11e   :  { %v239_v11 = vpop.f32.mrb[0].mxu1 }
 0x11f   :  { %v1076_v12 = vpop.f32.mrb[1].mxu1 }
 0x120   :  { %v242_v13 = vpop.f32.mrb[2].mxu1 }
 0x121   :  { %v1077_v14 = vpop.f32.mrb[3].mxu1 }
 0x125   :  { %v183_v15 = vpop.f32.mrb[0].mxu0 }
 0x126   :  { %v240_v17 = vadd.f32 %v239_v11, %v183_v15  ;;  %v1068_v18 = vpop.f32.mrb[1].mxu0 }
 0x127   :  { %v186_v19 = vpop.f32.mrb[2].mxu0 }
 0x128   :  { %v1069_v20 = vpop.f32.mrb[3].mxu0  ;;  %v252_v21 = vadd.f32 %v983_v16, %v240_v17 }
 0x12a   :  { %v254_v22 = vsel %vm253_vm3, %v252_v21, -inf }
 0x12b   :  { %255 = vmax.xlane.f32.xlu0 %v254_v22 }
 0x12d   :  { %v449_v22 = vpop.f32.mrb[4].mxu0 }
 0x1b8   :  { %v256_v23 = vpop.xlane.xlu0 %255 }
 0x1b9   :  { %v257_v24 = vsub.f32 %v252_v21, %v256_v23  ;;  %v1096_v23 = vpop.f32.mrb[5].mxu0 }
 0x1bb   :  { %v258_v25 = vmul.f32 1.442695, %v257_v24  ;;  %v452_v24 = vpop.f32.mrb[6].mxu0 }
 0x1bd   :  { %1187 = vpow2.f32 %v258_v25  ;;  %v1097_v25 = vpop.f32.mrb[7].mxu0 }
 0x1be   :  { %v524_v30 = vpop.f32.mrb[8].mxu0 }
 0x1c7   :  { %v1188_v26 = vpop.eup %1187 }
 0x1c8   :  { %v260_v27 = vsel %vm253_vm3, %v1188_v26, 0.0 }
 0x1c9   :  { %261 = vadd.xlane.f32.xlu0 %v260_v27  ;;  %v1178_v27 = vld [vmem:[%s1718_s12] sm:$0xff]  }
 0x1ca   :  { %1131 = vmatpush3.bf16.msra.mxu0 %v1178_v27 }
 0x1cb   :  { %1132 = vmatprep.subr.bf16.mxu0 %v1321_v0 }
 0x1ce   :  { %1133 = vmatpush3.bf16.msra.mxu0 %v1180_v29 }
 0x1cf   :  { %1146 = vmatprep.subr.bf16.mxu0 %v1321_v0 }
 0x256   :  { %v262_v28 = vpop.xlane.xlu0 %261 }
 0x257   :  { %1189 = vrcp.f32 %v262_v28  ;;  %v1179_v28 = vld [vmem:[%s1716_s10 + $0x8] sm:$0xff]  }
 0x261   :  { %v1190_v33 = vpop.eup %1189 }
 0x262   :  { %v264_v34 = vmul.f32 %v1190_v33, %v1188_v26  ;;  %v1177_v26 = vld [vmem:[%s1716_s10] sm:$0xff]  }
 0x264   :  { %v280_v35 = vrot.slane %v264_v34, %v279_v31  ;;  %265 = vst.msk [vmem:[#allocation11] sm:$0x3] %vm253_vm3, %v264_v34  ;;  %v269_v36 = vrot.slane %v264_v34, %v268_v32  ;;  %v1104_v31 = vpop.f32.mrb[9].mxu0 }
 0x265   :  { %v527_v32 = vpop.f32.mrb[10].mxu0 }
 0x266   :  { %282 = vbcast.lane.b32.xlu0 %v280_v35, 256  ;;  %271 = vbcast.lane.b32.xlu1 %v269_v36, 256  ;;  %v1105_v33 = vpop.f32.mrb[11].mxu0 }
 0x267   :  { %v653_v34 = vpop.f32.mrb[12].mxu0 }
 0x26a   :  { %275 = vbcast.lane.b32.xlu1 %v269_v36, 264 }
 0x26e   :  { %286 = vbcast.lane.b32.xlu1 %v280_v35, 264  ;;  %v1120_v35 = vpop.f32.mrb[13].mxu0 }
 0x26f   :  { %v656_v36 = vpop.f32.mrb[14].mxu0 }
 0x270   :  { %v1121_v37 = vpop.f32.mrb[15].mxu0 }
 0x2d8   :  { %v272_v50 = vpop.permute.xlu1 %271  ;;  %v283_v54 = vpop.permute.xlu0 %282 }
 0x2d9   :  { %v292_v52 = vmul.f32 %v288_v49, %v272_v50  ;;  %v294_v58 = vmul.f32 %v290_v53, %v283_v54  ;;  %v1182_v50 = vld [vmem:[%s1717_s11 + $0x8] sm:$0xff]   ;;  %v1185_v53 = vld [vmem:[%s1726_s20] sm:$0xff]  }
 0x2da   :  { %v1186_v54 = vld [vmem:[%s1726_s20 + $0x8] sm:$0xff]  }
 0x2db   :  { %v296_v59 = vsel %vm145_vm2, %v292_v52, 0.0  ;;  %v306_v2 = vsel %vm145_vm2, %v294_v58, 0.0  ;;  %v1184_v52 = vld [vmem:[%s1721_s15 + $0x8] sm:$0xff]  }
 0x2dc   :  { %v276_v55 = vpop.permute.xlu1 %275 }
 0x2dd   :  { %v293_v56 = vmul.f32 %v289_v51, %v276_v55  ;;  %v1183_v51 = vld [vmem:[%s1721_s15] sm:$0xff]  }
 0x2df   :  { %v298_v60 = vsel %vm297_vm4, %v293_v56, 0.0  ;;  %v999_v56 = vld [vmem:[%s1722_s16] ss:$0 sm:$0xff] }
 0x2e0   :  { %v299_v61 = vadd.f32 %v298_v60, %v296_v59  ;;  %v287_v62 = vpop.permute.xlu1 %286 }
 0x2e1   :  { %v295_v63 = vmul.f32 %v291_v57, %v287_v62 }
 0x2e2   :  { %v300_v1 = vrot.slane %v299_v61, 4 }
 0x2e3   :  { %v307_v3 = vsel %vm297_vm4, %v295_v63, 0.0 }
 0x2e4   :  { %v301_v4 = vadd.f32 %v300_v1, %v299_v61  ;;  %v308_v5 = vadd.f32 %v307_v3, %v306_v2 }
 0x2e6   :  { %v302_v6 = vrot.slane %v301_v4, 2  ;;  %v309_v7 = vrot.slane %v308_v5, 4 }
 0x2e8   :  { %v303_v8 = vadd.f32 %v302_v6, %v301_v4  ;;  %v310_v9 = vadd.f32 %v309_v7, %v308_v5 }
 0x2ea   :  { %v304_v10 = vrot.slane %v303_v8, 1  ;;  %v311_v11 = vrot.slane %v310_v9, 2 }
 0x2ec   :  { %v305_v12 = vadd.f32 %v304_v10, %v303_v8  ;;  %v312_v13 = vadd.f32 %v311_v11, %v310_v9 }
 0x2ee   :  { %v313_v14 = vrot.slane %v312_v13, 1  ;;  %v319_v15 = vpack.c.bf16 %v305_v12, %v305_v12 }
 0x2f0   :  { %v314_v16 = vadd.f32 %v313_v14, %v312_v13  ;;  %v331_v18 = vunpack.c.l.b16 %v319_v15 }
 0x2f2   :  { %v320_v17 = vpack.c.bf16 %v314_v16, %v314_v16  ;;  %v1013_v16 = vld [vmem:[%s1725_s19] ss:$0 sm:$0xff] }
 0x2f4   :  { %v332_v19 = vunpack.c.l.b16 %v320_v17 }
 0x2f6   :  { %v334_v20 = vsel %vm333_vm5, %v332_v19, %v331_v18 }
 0x2f7   :  { %v335_v21 = vpack.c.b16 %v334_v20, %v334_v20  ;;  %v1009_v20 = vld [vmem:[%s1724_s18] ss:$0 sm:$0xff]  ;;  %s1323_s18 = smov [#allocation9]  }
 0x2f8   :  { %s948_s19 = sshll.u32 %s1323_s18, 4  ;;  %s949_s19 = int_to_ptr.vmem [resolvable:$true] %s948_s19 }
 0x2f9   :  { %1087 = vmatmul.mubr.msk.bf16.vlgmr.msra.gmra.mrb[4].mxu1 %vm145_vm2, %v335_v21  ;;  %s1245_s30 = scalar_lea.vmem %s949_s19, 32  ;;  %p1250_p3 = scmp.lt.s32.totalorder %s949_s19, %s949_s19 }
 0x2fa   :  { %1110 = vmatprep.mubr.msk.bf16.mxu1 %vm1322_vm0, %v1321_v0  ;;  %1107 = vmatpush3.bf16.msra.mxu1 %v1177_v26  ;;  %p1246_p2 = scmp.ne.s32.totalorder %s949_s19, %s1245_s30  ;;  %p1251_p4 = scmp.lt.s32.totalorder %s1245_s30, %s1245_s30 }
 0x2fb   :  { %1108 = vmatprep.subr.bf16.mxu1 %v1321_v0 }
 0x2fc   :  { %p1252_p5 = por %p1251_p4, %p1250_p3 }
 0x2fe   :  { %1109 = vmatpush3.bf16.msra.mxu1 %v1179_v28  ;;  %p1253_p6 = pnand %p1252_p5, %p1246_p2 }
 0x2ff   :  { %1122 = vmatprep.subr.bf16.mxu1 %v1321_v0 }
 0x3cc   :  { %v397_v38 = vpop.f32.mrb[4].mxu1 }
 0x3cd   :  { %v450_v40 = vadd.f32 %v449_v22, %v397_v38  ;;  %v1088_v41 = vpop.f32.mrb[5].mxu1 }
 0x3ce   :  { %v400_v42 = vpop.f32.mrb[6].mxu1 }
 0x3cf   :  { %v462_v43 = vadd.f32 %v992_v39, %v450_v40  ;;  %v1089_v44 = vpop.f32.mrb[7].mxu1 }
 0x3d1   :  { %v463_v47 = vmax.f32 %v462_v43, 0.0 }
 0x3d3   :  { %v464_v49 = vpack.c.bf16 %v463_v47, %v463_v47 }
 0x3d5   :  { %1111 = vmatmul.mubr.msk.bf16.vlgmr.msra.gmra.mrb[8].mxu1 %vm201_vm1, %v464_v49  ;;  %1135 = vmatmul.mubr.msk.bf16.vlgmr.msra.gmra.mrb[16].mxu0 %vm201_vm1, %v464_v49 }
 0x3d6   :  { %1123 = vmatpush3.bf16.msra.mxu1 %v1181_v48  ;;  %1126 = vmatprep.mubr.msk.bf16.mxu1 %vm1322_vm0, %v1321_v0 }
 0x3d7   :  { %1124 = vmatprep.subr.bf16.mxu1 %v1321_v0  ;;  %1150 = vmatprep.mubr.msk.bf16.mxu0 %vm1322_vm0, %v1321_v0 }
 0x3d8   :  { %1147 = vmatpush3.bf16.msra.mxu0 %v1185_v53 }
 0x3d9   :  { %1148 = vmatprep.subr.bf16.mxu0 %v1321_v0 }
 0x3da   :  { %1125 = vmatpush3.bf16.msra.mxu1 %v1182_v50 }
 0x3db   :  { %1138 = vmatprep.subr.bf16.mxu1 %v1321_v0 }
 0x3dc   :  { %1149 = vmatpush3.bf16.msra.mxu0 %v1186_v54 }
 0x3dd   :  { %1127 = vmatmul.mubr.msk.bf16.vlgmr.msra.gmra.mrb[12].mxu1 %vm201_vm1, %v464_v49 }
 0x3de   :  { %1139 = vmatpush3.bf16.msra.mxu1 %v1183_v51  ;;  %1142 = vmatprep.mubr.msk.bf16.mxu1 %vm1322_vm0, %v1321_v0 }
 0x3df   :  { %1140 = vmatprep.subr.bf16.mxu1 %v1321_v0  ;;  %v1007_v0 = vld [vmem:[%s1723_s17] ss:$0 sm:$0xff] }
 0x3e2   :  { %1141 = vmatpush3.bf16.msra.mxu1 %v1184_v52 }
 0x3e5   :  { %1143 = vmatmul.mubr.msk.bf16.vlgmr.msra.gmra.mrb[16].mxu1 %vm201_vm1, %v1562_v46 }
 0x4a8   :  { %v579_v55 = vpop.f32.mrb[8].mxu1  ;;  %v782_v57 = vpop.f32.mrb[16].mxu0 }
 0x4a9   :  { %v580_v58 = vadd.f32 %v579_v55, %v524_v30  ;;  %v1112_v46 = vpop.f32.mrb[9].mxu1  ;;  %v1136_v59 = vpop.f32.mrb[17].mxu0  ;;  %v783_v22 = vadd.f32 %v1009_v20, %v782_v57 }
 0x4aa   :  { %v582_v60 = vpop.f32.mrb[10].mxu1  ;;  %v785_v61 = vpop.f32.mrb[18].mxu0 }
 0x4ab   :  { %v592_v62 = vadd.f32 %v999_v56, %v580_v58  ;;  %v1113_v63 = vpop.f32.mrb[11].mxu1  ;;  %v1137_v1 = vpop.f32.mrb[19].mxu0 }
 0x4ad   :  { %v1000_v2 = vmul.f32 -1.442695, %v592_v62 }
 0x4af   :  { %1191 = vpow2.f32 %v1000_v2 }
 0x4b0   :  { %v705_v3 = vpop.f32.mrb[12].mxu1 }
 0x4b1   :  { %v706_v4 = vadd.f32 %v705_v3, %v653_v34  ;;  %v1128_v5 = vpop.f32.mrb[13].mxu1 }
 0x4b2   :  { %v708_v6 = vpop.f32.mrb[14].mxu1 }
 0x4b3   :  { %v718_v7 = vadd.f32 %v1007_v0, %v706_v4  ;;  %v1129_v8 = vpop.f32.mrb[15].mxu1 }
 0x4b5   :  { %v1008_v9 = vmul.f32 -1.442695, %v718_v7 }
 0x4b7   :  { %1193 = vpow2.f32 %v1008_v9 }
 0x4b8   :  { %v845_v10 = vpop.f32.mrb[16].mxu1 }
 0x4b9   :  { %v1192_v11 = vpop.eup %1191  ;;  %v1144_v12 = vpop.f32.mrb[17].mxu1  ;;  %v846_v19 = vadd.f32 %v1013_v16, %v845_v10 }
 0x4ba   :  { %v596_v13 = vadd.f32 1.0, %v1192_v11  ;;  %v848_v14 = vpop.f32.mrb[18].mxu1 }
 0x4bb   :  { %v1145_v15 = vpop.f32.mrb[19].mxu1 }
 0x4bc   :  { %1195 = vrcp.f32 %v596_v13 }
 0x4c1   :  { %v1194_v17 = vpop.eup %1193 }
 0x4c2   :  { %v722_v18 = vadd.f32 1.0, %v1194_v17 }
 0x4c4   :  { %1197 = vrcp.f32 %v722_v18 }
 0x4c6   :  { %v1196_v21 = vpop.eup %1195 }
 0x4c7   :  { %v851_v23 = vmul.f32 %v1196_v21, %v846_v19 }
 0x4c9   :  { %v852_v24 = vadd.f32 %v851_v23, %v783_v22 }
 0x4cb   :  { %1199 = vtanh.f32 %v852_v24 }
 0x4ce   :  { %v1198_v25 = vpop.eup %1197 }
 0x4cf   :  { %v854_v26 = vsub.f32 1.0, %v1198_v25  ;;  %v856_v28 = vmul.f32 %v1198_v25, %v1557_v45 }
 0x4d5   :  { %v1200_v27 = vpop.eup %1199 }
 0x4d6   :  { %v855_v29 = vmul.f32 %v1200_v27, %v854_v26 }
 0x4d8   :  { %v857_v30 = vadd.f32 %v856_v28, %v855_v29 }
 0x4da   :  { %859 = vst.msk [vmem:[#allocation2] sm:$0x3] %vm858_vm6, %v857_v30  ;;  %860 = vst.msk [vmem:[#allocation9] sm:$0x3] %vm858_vm6, %v857_v30 }
 0x4e1   :  { %v861_v31 = vld [vmem:[#allocation2] sm:$0x3] }
 0x4e2   :  { %v862_v32 = vpack.c.bf16 %v861_v31, %v861_v31 }
 0x4e4   :  { %1151 = vmatmul.mubr.msk.bf16.vlgmr.msra.gmra.mrb[20].mxu0 %vm201_vm1, %v862_v32 }
 0x4e5   :  { %1256 = shalt.err (!%p1253_p6)
}
 0x4e6   :  { %s1257_s10 = scalar_lea.hbm %s1729_s23, 32 }
 0x4e7   :  { %p1258_p7 = scmp.ne.s32.totalorder %s1729_s23, %s1257_s10  ;;  %p1261_p8 = scmp.lt.u32.totalorder %s1257_s10, %s1729_s23 }
 0x4e9   :  { %p1263_p9 = pnand %p1261_p8, %p1258_p7 }
 0x4eb   :  { %1266 = shalt.err (!%p1263_p9)
}
 0x4ec   :  { %951 = dma.vmem_to_hbm [thread:$0]  %s949_s19, 32, %s1729_s23, [#allocation10]  }
 0x4ed   :  { %s1324_s8 = smov [#allocation11]  }
 0x4ee   :  { %s958_s14 = sshll.u32 %s1324_s8, 4  ;;  %s959_s14 = int_to_ptr.vmem [resolvable:$true] %s958_s14 }
 0x4ef   :  { %s1267_s11 = scalar_lea.vmem %s959_s14, 32  ;;  %p1272_p11 = scmp.lt.s32.totalorder %s959_s14, %s959_s14 }
 0x4f0   :  { %p1268_p10 = scmp.ne.s32.totalorder %s959_s14, %s1267_s11  ;;  %p1273_p12 = scmp.lt.s32.totalorder %s1267_s11, %s1267_s11 }
 0x4f2   :  { %p1274_p13 = por %p1273_p12, %p1272_p11 }
 0x4f4   :  { %p1275_p0 = pnand %p1274_p13, %p1268_p10 }
 0x4f6   :  { %1278 = shalt.err (!%p1275_p0)
}
 0x4f7   :  { %s1279_s28 = scalar_lea.hbm %s1730_s24, 32 }
 0x4f8   :  { %p1280_p1 = scmp.ne.s32.totalorder %s1730_s24, %s1279_s28  ;;  %p1283_p2 = scmp.lt.u32.totalorder %s1279_s28, %s1730_s24 }
 0x4fa   :  { %p1285_p3 = pnand %p1283_p2, %p1280_p1 }
 0x4fc   :  { %1288 = shalt.err (!%p1285_p3)
}
 0x4fd   :  { %961 = dma.vmem_to_hbm [thread:$0]  %s959_s14, 32, %s1730_s24, [#allocation10]   ;;  %v1017_v45 = vld [vmem:[%s1727_s21] ss:$0 sm:$0xff] }
 0x4fe   :  { %s1325_s17 = smov [#allocation8]  }
 0x4ff   :  { %s938_s2 = sshll.u32 %s1325_s17, 4  ;;  %s939_s2 = int_to_ptr.vmem [resolvable:$true] %s938_s2 }
 0x500   :  { %s1289_s18 = scalar_lea.vmem %s939_s2, 32  ;;  %p1294_p5 = scmp.lt.s32.totalorder %s939_s2, %s939_s2 }
 0x501   :  { %p1290_p4 = scmp.ne.s32.totalorder %s939_s2, %s1289_s18  ;;  %p1295_p6 = scmp.lt.s32.totalorder %s1289_s18, %s1289_s18 }
 0x503   :  { %p1296_p7 = por %p1295_p6, %p1294_p5 }
 0x505   :  { %p1297_p8 = pnand %p1296_p7, %p1290_p4 }
 0x5b7   :  { %v924_v33 = vpop.f32.mrb[20].mxu0 }
 0x5b8   :  { %v925_v34 = vadd.f32 %v1017_v45, %v924_v33  ;;  %v1152_v35 = vpop.f32.mrb[21].mxu0 }
 0x5b9   :  { %v927_v36 = vpop.f32.mrb[22].mxu0 }
 0x5ba   :  { %931 = vst.msk [vmem:[#allocation8] sm:$0x3] %vm297_vm4, %v925_v34  ;;  %v1153_v37 = vpop.f32.mrb[23].mxu0 }
 0x5bb   :  { %1300 = shalt.err (!%p1297_p8)
}
 0x5bc   :  { %s1301_s21 = scalar_lea.hbm %s1728_s22, 32 }
 0x5bd   :  { %p1302_p9 = scmp.ne.s32.totalorder %s1728_s22, %s1301_s21  ;;  %p1305_p10 = scmp.lt.u32.totalorder %s1301_s21, %s1728_s22 }
 0x5bf   :  { %p1307_p11 = pnand %p1305_p10, %p1302_p9 }
 0x5c1   :  { %1310 = shalt.err (!%p1307_p11)
}
 0x5c2   :  { %941 = dma.vmem_to_hbm [thread:$0]  %s939_s2, 32, %s1728_s22, [#allocation5]  }
 0x5c3   :  { %1315 = dma.done.wait [#allocation5], 32  }
 0x5c4   :  { %1316 = vsyncadd [#allocation5], 4294967264 }
 0x5c5   :  { %1317 = dma.done.wait [#allocation10], 64  }
 0x5c6   :  { %1318 = vsyncadd [#allocation10], 4294967232 }
 0x5c7   :  { %971 = vsyncpa [#allocation4], 1 }
 0x5c8   :  { %972 = vsyncpa [#allocation7], 1 }
 0x5c9   :  { %973 = vsyncpa [#allocation5], 1 }
 0x5ca   :  { %974 = vsyncpa [#allocation10], 1 }

</bundles_post_ra>
